<compile_context>
chip_gen: v5e
topology: v5e:2x2
jax: 0.10.0
libtpu: 0.0.40
codegen_flags: <defaults>
</compile_context>

<pallas_src>
import functools

import jax
import jax.numpy as jnp
from jax.experimental import pallas as pl
from jax.experimental.pallas import tpu as pltpu


# ----------------------------------------------------------------------------
# helpers
# ----------------------------------------------------------------------------
def _round_up(x, m):
    return ((x + m - 1) // m) * m


def _tile_and_pad(dim, max_tile, align):
    """Pick a tile (multiple of `align`, <= max_tile) and a padded dim it divides."""
    tile = min(max_tile, _round_up(dim, align))
    padded = _round_up(dim, tile)
    return tile, padded


def _pad2(a, rows, cols):
    return jnp.pad(a, ((0, rows - a.shape[0]), (0, cols - a.shape[1])))


def _pad_row(b, width):
    return jnp.pad(b, (0, width - b.shape[0]))[None, :]


def _gcn_norm_dense(edge_index, num_nodes):
    """Dense A_hat mirroring torch_geometric gcn_norm (self loops + D^-1/2 A D^-1/2)."""
    src, dst = edge_index[0], edge_index[1]
    adj = jnp.zeros((num_nodes, num_nodes), jnp.float32)
    adj = adj.at[dst, src].add(1.0)                        # message flows src -> dst
    adj = adj + jnp.eye(num_nodes, dtype=jnp.float32)      # add self loops
    deg = jnp.sum(adj, axis=1)
    dinv = jnp.where(deg > 0, jax.lax.rsqrt(deg), 0.0)
    return dinv[:, None] * adj * dinv[None, :]


# ----------------------------------------------------------------------------
# tiled matmul kernel with fused bias + optional ReLU epilogue
# ----------------------------------------------------------------------------
def _matmul_kernel(a_ref, b_ref, bias_ref, o_ref, acc_ref, *, apply_relu):
    @pl.when(pl.program_id(2) == 0)
    def _():
        acc_ref[...] = jnp.zeros_like(acc_ref)

    acc_ref[...] += jnp.dot(a_ref[...], b_ref[...],
                            preferred_element_type=jnp.float32)

    @pl.when(pl.program_id(2) == pl.num_programs(2) - 1)
    def _():
        out = acc_ref[...] + bias_ref[...]
        if apply_relu:
            out = jnp.maximum(out, 0.0)
        o_ref[...] = out.astype(o_ref.dtype)


def matmul_bias_act(a, b, bias, *, tm, tn, tk, relu=False):
    """out = act(a @ b + bias); a:[M,K], b:[K,N], bias:[1,N]."""
    m, k = a.shape
    k2, n = b.shape
    assert k == k2 and m % tm == 0 and n % tn == 0 and k % tk == 0

    kernel = functools.partial(_matmul_kernel, apply_relu=relu)
    return pl.pallas_call(
        kernel,
        out_shape=jax.ShapeDtypeStruct((m, n), jnp.float32),
        grid_spec=pltpu.PrefetchScalarGridSpec(
            num_scalar_prefetch=0,
            grid=(m // tm, n // tn, k // tk),
            in_specs=[
                pl.BlockSpec((tm, tk), lambda i, j, kk: (i, kk)),
                pl.BlockSpec((tk, tn), lambda i, j, kk: (kk, j)),
                pl.BlockSpec((1, tn), lambda i, j, kk: (0, j)),
            ],
            out_specs=pl.BlockSpec((tm, tn), lambda i, j, kk: (i, j)),
            scratch_shapes=[pltpu.VMEM((tm, tn), jnp.float32)],
        ),
        compiler_params=pltpu.CompilerParams(
            dimension_semantics=("parallel", "parallel", "arbitrary")),
    )(a, b, bias)


# ----------------------------------------------------------------------------
# global mean pool kernel (segment mean over batch assignment)
# ----------------------------------------------------------------------------
def _global_mean_pool_kernel(batch_ref, x_ref, o_ref, cnt_ref, *, num_graphs_padded):
    @pl.when(pl.program_id(0) == 0)
    def _():
        o_ref[...] = jnp.zeros_like(o_ref)
        cnt_ref[...] = jnp.zeros_like(cnt_ref)

    tile_n = x_ref.shape[0]
    b_row = batch_ref[...]  # [1, tile_n] int32 — lane-major, no relayout needed
    graph_iota = jax.lax.broadcasted_iota(
        jnp.int32, (num_graphs_padded, tile_n), 0)
    onehot = (graph_iota == b_row).astype(jnp.float32)  # [B_pad, tile_n]

    # Segment sum via MXU: [B_pad, tile_n] @ [tile_n, F] -> [B_pad, F]
    o_ref[...] += jnp.dot(onehot, x_ref[...], preferred_element_type=jnp.float32)
    cnt_ref[...] += jnp.sum(onehot, axis=1, keepdims=True)

    @pl.when(pl.program_id(0) == pl.num_programs(0) - 1)
    def _():
        o_ref[...] = o_ref[...] / jnp.maximum(cnt_ref[...], 1.0)


def global_mean_pool(x, batch_row, num_graphs_padded, *, tile_n):
    """x: [N_pad, F_pad] f32, batch_row: [1, N_pad] int32 (pad ids >= num_graphs)."""
    n_pad, f_pad = x.shape
    assert n_pad % tile_n == 0

    kernel = functools.partial(
        _global_mean_pool_kernel, num_graphs_padded=num_graphs_padded)
    return pl.pallas_call(
        kernel,
        out_shape=jax.ShapeDtypeStruct((num_graphs_padded, f_pad), jnp.float32),
        grid_spec=pltpu.PrefetchScalarGridSpec(
            num_scalar_prefetch=0,
            grid=(n_pad // tile_n,),
            in_specs=[
                pl.BlockSpec((1, tile_n), lambda i: (0, i)),     # batch ids (lane row)
                pl.BlockSpec((tile_n, f_pad), lambda i: (i, 0)),  # node features
            ],
            out_specs=pl.BlockSpec((num_graphs_padded, f_pad), lambda i: (0, 0)),
            scratch_shapes=[pltpu.VMEM((num_graphs_padded, 1), jnp.float32)],
        ),
        compiler_params=pltpu.CompilerParams(
            dimension_semantics=("arbitrary",)),  # reduction over node tiles
    )(batch_row, x)


# ----------------------------------------------------------------------------
# GCN_2l forward (Pallas path)
# ----------------------------------------------------------------------------
def gcn2l_forward(x, edge_index, batch, num_graphs, params):
    n, f_in = x.shape
    h_dim = params["w1"].shape[1]
    c_dim = params["wf"].shape[1]

    # --- graph preprocessing (pure JAX: sparse scatter -> dense A_hat) ---
    a_hat = _gcn_norm_dense(edge_index, n)

    # --- TPU-friendly padding / tiling (lane-dense 128 multiples, big node tiles) ---
    node_tile, n_pad = _tile_and_pad(n, 512, 128)
    fin_tile, fin_pad = _tile_and_pad(f_in, 512, 128)
    hid_tile, h_pad = _tile_and_pad(h_dim, 512, 128)
    cls_tile, c_pad = _tile_and_pad(c_dim, 512, 128)
    _, b_pad = _tile_and_pad(num_graphs, 256, 8)
    graph_tile = b_pad if b_pad <= 256 else 256

    x_p = _pad2(x, n_pad, fin_pad)
    a_p = _pad2(a_hat, n_pad, n_pad)
    w1_p = _pad2(params["w1"], fin_pad, h_pad)
    b1_p = _pad_row(params["b1"], h_pad)
    w2_p = _pad2(params["w2"], h_pad, h_pad)
    b2_p = _pad_row(params["b2"], h_pad)
    wf_p = _pad2(params["wf"], h_pad, c_pad)
    bf_p = _pad_row(params["bf"], c_pad)
    zeros_h = jnp.zeros((1, h_pad), jnp.float32)

    # padded node slots get batch id == b_pad -> never matched by the one-hot
    batch_row = jnp.full((1, n_pad), b_pad, dtype=jnp.int32)
    batch_row = batch_row.at[0, :n].set(batch.astype(jnp.int32))

    # layer 1: relu(A_hat @ (x @ W1) + b1)
    xw = matmul_bias_act(x_p, w1_p, zeros_h,
                         tm=node_tile, tn=hid_tile, tk=fin_tile)
    h1 = matmul_bias_act(a_p, xw, b1_p,
                         tm=node_tile, tn=hid_tile, tk=node_tile, relu=True)
    # layer 2: relu(A_hat @ (h1 @ W2) + b2)
    hw = matmul_bias_act(h1, w2_p, zeros_h,
                         tm=node_tile, tn=hid_tile, tk=hid_tile)
    h2 = matmul_bias_act(a_p, hw, b2_p,
                         tm=node_tile, tn=hid_tile, tk=node_tile, relu=True)
    # readout: global mean pool over the batch vector
    pooled = global_mean_pool(h2, batch_row, b_pad, tile_n=node_tile)
    # ffn: Linear(dim_hidden -> num_classes)   (dropout is never applied in forward)
    logits = matmul_bias_act(pooled, wf_p, bf_p,
                             tm=graph_tile, tn=cls_tile, tk=hid_tile)
    return logits[:num_graphs, :c_dim]


# ----------------------------------------------------------------------------
# pure-JAX reference
# ----------------------------------------------------------------------------
def gcn2l_ref(x, edge_index, batch, num_graphs, params):
    mm = functools.partial(jnp.matmul, precision=jax.lax.Precision.HIGHEST)
    a_hat = _gcn_norm_dense(edge_index, x.shape[0])
    h = jnp.maximum(mm(a_hat, mm(x, params["w1"])) + params["b1"], 0.0)
    h = jnp.maximum(mm(a_hat, mm(h, params["w2"])) + params["b2"], 0.0)
    sums = jax.ops.segment_sum(h, batch, num_segments=num_graphs)
    cnt = jax.ops.segment_sum(jnp.ones((x.shape[0],), jnp.float32), batch,
                              num_segments=num_graphs)
    pooled = sums / jnp.maximum(cnt, 1.0)[:, None]
    return mm(pooled, params["wf"]) + params["bf"]


# ----------------------------------------------------------------------------
# demo
# ----------------------------------------------------------------------------
if __name__ == "__main__":
    key = jax.random.PRNGKey(0)
    keys = jax.random.split(key, 10)

    num_nodes = 64      # N
    dim_node = 32       # input feature dim
    dim_hidden = 64     # hidden dim
    num_classes = 6     # classes
    num_graphs = 4      # graphs in the batch
    num_edges = 192     # E

    x = jax.random.normal(keys[0], (num_nodes, dim_node), dtype=jnp.float32)
    src = jax.random.randint(keys[1], (num_edges,), 0, num_nodes, dtype=jnp.int32)
    off = jax.random.randint(keys[2], (num_edges,), 1, num_nodes, dtype=jnp.int32)
    dst = (src + off) % num_nodes                       # no explicit self loops
    edge_index = jnp.stack([src, dst])
    batch = jnp.sort(jax.random.randint(keys[3], (num_nodes,), 0, num_graphs,
                                        dtype=jnp.int32))

    def _lin(k, fin, fout):
        return jax.random.normal(k, (fin, fout), jnp.float32) / jnp.sqrt(
            jnp.float32(fin))

    params = dict(
        w1=_lin(keys[4], dim_node, dim_hidden),
        b1=0.1 * jax.random.normal(keys[5], (dim_hidden,), jnp.float32),
        w2=_lin(keys[6], dim_hidden, dim_hidden),
        b2=0.1 * jax.random.normal(keys[7], (dim_hidden,), jnp.float32),
        wf=_lin(keys[8], dim_hidden, num_classes),
        bf=0.1 * jax.random.normal(keys[9], (num_classes,), jnp.float32),
    )

    out = gcn2l_forward(x, edge_index, batch, num_graphs, params)
    out = jax.block_until_ready(out)

    ref = gcn2l_ref(x, edge_index, batch, num_graphs, params)
    assert out.shape == (num_graphs, num_classes)
    assert jnp.allclose(out, ref, atol=1e-3, rtol=1e-3), "mismatch vs reference"

    print("KERNEL_OK")
</pallas_src>

<mosaic_0001>
module attributes {stable_mosaic.version = 11 : i64} {
  func.func @_matmul_kernel(%arg0: i32, %arg1: i32, %arg2: i32, %arg3: memref<128x128xf32, #tpu.memory_space<vmem>>, %arg4: memref<128x128xf32, #tpu.memory_space<vmem>>, %arg5: memref<1x128xf32, #tpu.memory_space<vmem>>, %arg6: memref<128x128xf32, #tpu.memory_space<vmem>>, %arg7: memref<128x128xf32, #tpu.memory_space<vmem>>) attributes {dimension_semantics = [#tpu.dimension_semantics<parallel>, #tpu.dimension_semantics<parallel>, #tpu.dimension_semantics<arbitrary>], iteration_bounds = array<i64: 1, 1, 1>, scalar_prefetch = 0 : i64, scratch_operands = 1 : i64, tpu.core_type = #tpu.core_type<tc>, window_params = [{transform_indices = @transform_0, window_bounds = array<i64: 128, 128>}, {transform_indices = @transform_1, window_bounds = array<i64: 128, 128>}, {transform_indices = @transform_2, window_bounds = array<i64: 1, 128>}, {transform_indices = @transform_3, window_bounds = array<i64: 128, 128>}]} {
    %c0_i32 = arith.constant 0 : i32
    %0 = arith.cmpi eq, %arg2, %c0_i32 : i32
    %1 = arith.extui %0 : i1 to i32
    %c0_i32_0 = arith.constant 0 : i32
    %2 = arith.cmpi ne, %1, %c0_i32_0 : i32
    scf.if %2 {
      %cst_10 = arith.constant 0.000000e+00 : f32
      %12 = vector.broadcast %cst_10 : f32 to vector<128x128xf32>
      %c0_11 = arith.constant 0 : index
      %c0_12 = arith.constant 0 : index
      %13 = vector.load %arg7[%c0_11, %c0_12] : memref<128x128xf32, #tpu.memory_space<vmem>>, vector<128x128xf32>
      tpu.vector_store %arg7[%c0_11, %c0_12], %12 {strides = array<i32>} : memref<128x128xf32, #tpu.memory_space<vmem>>, vector<128x128xf32>,
    } else {
    }
    %c0 = arith.constant 0 : index
    %c0_1 = arith.constant 0 : index
    %3 = vector.load %arg7[%c0, %c0_1] : memref<128x128xf32, #tpu.memory_space<vmem>>, vector<128x128xf32>
    %c0_2 = arith.constant 0 : index
    %c0_3 = arith.constant 0 : index
    %4 = vector.load %arg3[%c0_2, %c0_3] : memref<128x128xf32, #tpu.memory_space<vmem>>, vector<128x128xf32>
    %c0_4 = arith.constant 0 : index
    %c0_5 = arith.constant 0 : index
    %5 = vector.load %arg4[%c0_4, %c0_5] : memref<128x128xf32, #tpu.memory_space<vmem>>, vector<128x128xf32>
    %cst = arith.constant dense<0.000000e+00> : vector<128x128xf32>
    %6 = tpu.matmul %4, %5, %cst {dimension_numbers = #tpu.dot_dimension_numbers<[1], [0], [0], [1], [0, 0, 1, 1], [], []>} : vector<128x128xf32>, vector<128x128xf32>, vector<128x128xf32> -> vector<128x128xf32>
    %7 = arith.addf %3, %6 : vector<128x128xf32>
    %c0_6 = arith.constant 0 : index
    %c0_7 = arith.constant 0 : index
    %8 = vector.load %arg7[%c0_6, %c0_7] : memref<128x128xf32, #tpu.memory_space<vmem>>, vector<128x128xf32>
    tpu.vector_store %arg7[%c0_6, %c0_7], %7 {strides = array<i32>} : memref<128x128xf32, #tpu.memory_space<vmem>>, vector<128x128xf32>,
    %c0_i32_8 = arith.constant 0 : i32
    %9 = arith.cmpi eq, %arg2, %c0_i32_8 : i32
    %10 = arith.extui %9 : i1 to i32
    %c0_i32_9 = arith.constant 0 : i32
    %11 = arith.cmpi ne, %10, %c0_i32_9 : i32
    scf.if %11 {
      %c0_10 = arith.constant 0 : index
      %c0_11 = arith.constant 0 : index
      %12 = vector.load %arg7[%c0_10, %c0_11] : memref<128x128xf32, #tpu.memory_space<vmem>>, vector<128x128xf32>
      %c0_12 = arith.constant 0 : index
      %c0_13 = arith.constant 0 : index
      %13 = vector.load %arg5[%c0_12, %c0_13] : memref<1x128xf32, #tpu.memory_space<vmem>>, vector<1x128xf32>
      %14 = vector.broadcast %13 : vector<1x128xf32> to vector<128x128xf32>
      %15 = arith.addf %12, %14 : vector<128x128xf32>
      %c0_14 = arith.constant 0 : index
      %c0_15 = arith.constant 0 : index
      %16 = vector.load %arg6[%c0_14, %c0_15] : memref<128x128xf32, #tpu.memory_space<vmem>>, vector<128x128xf32>
      tpu.vector_store %arg6[%c0_14, %c0_15], %15 {strides = array<i32>} : memref<128x128xf32, #tpu.memory_space<vmem>>, vector<128x128xf32>,
    } else {
    }
    return
  }
  func.func @transform_0(%arg0: i32, %arg1: i32, %arg2: i32) -> (i32, i32) {
    %c0_i32 = arith.constant 0 : i32
    return %arg0, %arg2 : i32, i32
  }
  func.func @transform_1(%arg0: i32, %arg1: i32, %arg2: i32) -> (i32, i32) {
    %c0_i32 = arith.constant 0 : i32
    return %arg2, %arg1 : i32, i32
  }
  func.func @transform_2(%arg0: i32, %arg1: i32, %arg2: i32) -> (i32, i32) {
    %c0_i32 = arith.constant 0 : i32
    %c0_i32_0 = arith.constant 0 : i32
    return %c0_i32, %arg1 : i32, i32
  }
  func.func @transform_3(%arg0: i32, %arg1: i32, %arg2: i32) -> (i32, i32) {
    %c0_i32 = arith.constant 0 : i32
    return %arg0, %arg1 : i32, i32
  }
}

</mosaic_0001>

<bundles_post_ra>
// kernel: tpu_custom_call.1
= control target key start
LH: loop header
LB: loop body
LE: loop exit
PB: predicated region body
PF: predicated region fallthrough
CT: control target
= control target key end

     0   :  { %8 = vsyncpa [#allocation4], 0  ;;  %s465_s0 = inlined_call_operand.hbm [shape: f32[128,128], index: 0, kind: input, shape index: {}]   ;;  %s466_s1 = inlined_call_operand.hbm [shape: f32[128,128], index: 1, kind: input, shape index: {}]   ;;  %s467_s2 = inlined_call_operand.vmem [shape: f32[1,128], index: 2, kind: input, shape index: {}]   ;;  %s468_s3 = inlined_call_operand.hbm [shape: f32[128,128], index: 3, kind: output, shape index: {}]  }
   0x1   :  { %9 = vsyncpa [#allocation7], 0 }
   0x2   :  { %10 = vsyncpa [#allocation5], 0  ;;  %s15_s14 = sshll.u32 %s465_s0, 4  ;;  %s419_s15 = smov [#allocation3]   ;;  %s16_s14 = int_to_ptr.hbm [resolvable:$true] %s15_s14 }
   0x3   :  { %s17_s16 = sshll.u32 %s419_s15, 4  ;;  %s28_s19 = sshll.u32 %s466_s1, 4  ;;  %s18_s16 = int_to_ptr.vmem [resolvable:$true] %s17_s16  ;;  %s29_s19 = int_to_ptr.hbm [resolvable:$true] %s28_s19 }
   0x4   :  { %s420_s20 = smov 128   ;;  %s421_s21 = smov 8  }
   0x5   :  { %23 = dma.hbm_to_vmem [thread:$0]  %s16_s14, 2048, %s18_s16, [#allocation4], %s420_s20, %s420_s20, %s421_s21  }
   0x6   :  { %s422_s22 = smov [#allocation6]  }
   0x7   :  { %s30_s23 = sshll.u32 %s422_s22, 4  ;;  %s31_s23 = int_to_ptr.vmem [resolvable:$true] %s30_s23 }
   0x8   :  { %36 = dma.hbm_to_vmem [thread:$0]  %s29_s19, 2048, %s31_s23, [#allocation7], %s420_s20, %s420_s20, %s421_s21  }
   0x9   :  { %413 = dma.done.wait [#allocation4], 2048  }
   0xa   :  { %414 = vsyncadd [#allocation4], 4294965248 }
   0xb   :  { %415 = dma.done.wait [#allocation7], 2048  }
   0xc   :  { %416 = vsyncadd [#allocation7], 4294965248  ;;  %v114_v0 = vld [vmem:[#allocation6 + $0x78] sm:$0xff]  ;;  %v113_v1 = vld [vmem:[#allocation6 + $0x70] sm:$0xff]  ;;  %s273_s27 = sshll.u32 %s468_s3, 4  ;;  %s274_s27 = int_to_ptr.hbm [resolvable:$true] %s273_s27 }
   0xd   :  { %288 = vmatpush.msra.mxu2 %v114_v0  ;;  %289 = vmatpush.msra.mxu3 %v114_v0  ;;  %v112_v2 = vld [vmem:[#allocation6 + $0x68] sm:$0xff]  ;;  %v111_v3 = vld [vmem:[#allocation6 + $0x60] sm:$0xff]  ;;  %v110_v4 = vld [vmem:[#allocation6 + $0x58] sm:$0xff] }
   0xe   :  { %115 = vmatpush.msra.mxu0 %v114_v0  ;;  %287 = vmatpush.msra.mxu1 %v114_v0  ;;  %v109_v5 = vld [vmem:[#allocation6 + $0x50] sm:$0xff]  ;;  %v108_v6 = vld [vmem:[#allocation6 + $0x48] sm:$0xff]  ;;  %v107_v7 = vld [vmem:[#allocation6 + $0x40] sm:$0xff] }
   0xf   :  { %291 = vmatpush.msra.mxu2 %v113_v1  ;;  %292 = vmatpush.msra.mxu3 %v113_v1  ;;  %v106_v8 = vld [vmem:[#allocation6 + $0x38] sm:$0xff]  ;;  %v105_v9 = vld [vmem:[#allocation6 + $0x30] sm:$0xff]  ;;  %v104_v10 = vld [vmem:[#allocation6 + $0x28] sm:$0xff] }
  0x10   :  { %116 = vmatpush.msra.mxu0 %v113_v1  ;;  %290 = vmatpush.msra.mxu1 %v113_v1  ;;  %v103_v11 = vld [vmem:[#allocation6 + $0x20] sm:$0xff]  ;;  %v102_v12 = vld [vmem:[#allocation6 + $0x18] sm:$0xff]  ;;  %v101_v13 = vld [vmem:[#allocation6 + $0x10] sm:$0xff] }
  0x11   :  { %294 = vmatpush.msra.mxu2 %v112_v2  ;;  %295 = vmatpush.msra.mxu3 %v112_v2  ;;  %v100_v14 = vld [vmem:[#allocation6 + $0x8] sm:$0xff]  ;;  %v99_v15 = vld [vmem:[#allocation6] sm:$0xff]  ;;  %v93_v24 = vld [vmem:[#allocation3 + $0x50] sm:$0xff] }
  0x12   :  { %117 = vmatpush.msra.mxu0 %v112_v2  ;;  %293 = vmatpush.msra.mxu1 %v112_v2  ;;  %v91_v16 = vld [vmem:[#allocation3 + $0x40] sm:$0xff]  ;;  %v92_v20 = vld [vmem:[#allocation3 + $0x48] sm:$0xff]  ;;  %v97_v25 = vld [vmem:[#allocation3 + $0x70] sm:$0xff] }
  0x13   :  { %297 = vmatpush.msra.mxu2 %v111_v3  ;;  %298 = vmatpush.msra.mxu3 %v111_v3  ;;  %v95_v17 = vld [vmem:[#allocation3 + $0x60] sm:$0xff]  ;;  %v96_v21 = vld [vmem:[#allocation3 + $0x68] sm:$0xff]  ;;  %v85_v26 = vld [vmem:[#allocation3 + $0x10] sm:$0xff] }
  0x14   :  { %118 = vmatpush.msra.mxu0 %v111_v3  ;;  %296 = vmatpush.msra.mxu1 %v111_v3  ;;  %v83_v18 = vld [vmem:[#allocation3] sm:$0xff]  ;;  %v84_v22 = vld [vmem:[#allocation3 + $0x8] sm:$0xff]  ;;  %v89_v27 = vld [vmem:[#allocation3 + $0x30] sm:$0xff] }
  0x15   :  { %300 = vmatpush.msra.mxu2 %v110_v4  ;;  %301 = vmatpush.msra.mxu3 %v110_v4  ;;  %v87_v19 = vld [vmem:[#allocation3 + $0x20] sm:$0xff]  ;;  %v88_v23 = vld [vmem:[#allocation3 + $0x28] sm:$0xff]  ;;  %v94_v28 = vld [vmem:[#allocation3 + $0x58] sm:$0xff] }
  0x16   :  { %119 = vmatpush.msra.mxu0 %v110_v4  ;;  %299 = vmatpush.msra.mxu1 %v110_v4  ;;  %v98_v29 = vld [vmem:[#allocation3 + $0x78] sm:$0xff]  ;;  %v340_v32 = vld [vmem:[%s467_s2] ss:$0 sm:$0xff]  ;;  %s423_s2 = smov [#allocation8]  }
  0x17   :  { %303 = vmatpush.msra.mxu2 %v109_v5  ;;  %304 = vmatpush.msra.mxu3 %v109_v5  ;;  %v86_v30 = vld [vmem:[#allocation3 + $0x18] sm:$0xff]  ;;  %s271_s24 = sshll.u32 %s423_s2, 4  ;;  %s272_s24 = int_to_ptr.vmem [resolvable:$true] %s271_s24 }
  0x18   :  { %120 = vmatpush.msra.mxu0 %v109_v5  ;;  %302 = vmatpush.msra.mxu1 %v109_v5  ;;  %v90_v31 = vld [vmem:[#allocation3 + $0x38] sm:$0xff] }
  0x19   :  { %306 = vmatpush.msra.mxu2 %v108_v6  ;;  %307 = vmatpush.msra.mxu3 %v108_v6 }
  0x1a   :  { %121 = vmatpush.msra.mxu0 %v108_v6  ;;  %305 = vmatpush.msra.mxu1 %v108_v6 }
  0x1b   :  { %309 = vmatpush.msra.mxu2 %v107_v7  ;;  %310 = vmatpush.msra.mxu3 %v107_v7 }
  0x1c   :  { %122 = vmatpush.msra.mxu0 %v107_v7  ;;  %308 = vmatpush.msra.mxu1 %v107_v7 }
  0x1d   :  { %312 = vmatpush.msra.mxu2 %v106_v8  ;;  %313 = vmatpush.msra.mxu3 %v106_v8 }
  0x1e   :  { %123 = vmatpush.msra.mxu0 %v106_v8  ;;  %311 = vmatpush.msra.mxu1 %v106_v8 }
  0x1f   :  { %315 = vmatpush.msra.mxu2 %v105_v9  ;;  %316 = vmatpush.msra.mxu3 %v105_v9 }
  0x20   :  { %124 = vmatpush.msra.mxu0 %v105_v9  ;;  %314 = vmatpush.msra.mxu1 %v105_v9 }
  0x21   :  { %318 = vmatpush.msra.mxu2 %v104_v10  ;;  %319 = vmatpush.msra.mxu3 %v104_v10 }
  0x22   :  { %125 = vmatpush.msra.mxu0 %v104_v10  ;;  %317 = vmatpush.msra.mxu1 %v104_v10 }
  0x23   :  { %321 = vmatpush.msra.mxu2 %v103_v11  ;;  %322 = vmatpush.msra.mxu3 %v103_v11 }
  0x24   :  { %126 = vmatpush.msra.mxu0 %v103_v11  ;;  %320 = vmatpush.msra.mxu1 %v103_v11 }
  0x25   :  { %324 = vmatpush.msra.mxu2 %v102_v12  ;;  %325 = vmatpush.msra.mxu3 %v102_v12 }
  0x26   :  { %127 = vmatpush.msra.mxu0 %v102_v12  ;;  %323 = vmatpush.msra.mxu1 %v102_v12 }
  0x27   :  { %327 = vmatpush.msra.mxu2 %v101_v13  ;;  %328 = vmatpush.msra.mxu3 %v101_v13 }
  0x28   :  { %128 = vmatpush.msra.mxu0 %v101_v13  ;;  %326 = vmatpush.msra.mxu1 %v101_v13 }
  0x29   :  { %330 = vmatpush.msra.mxu2 %v100_v14  ;;  %331 = vmatpush.msra.mxu3 %v100_v14 }
  0x2a   :  { %129 = vmatpush.msra.mxu0 %v100_v14  ;;  %329 = vmatpush.msra.mxu1 %v100_v14 }
  0x2b   :  { %333 = vmatpush.msra.mxu2 %v99_v15  ;;  %334 = vmatpush.msra.mxu3 %v99_v15 }
  0x2c   :  { %155 = vmatmul.f32.vlgmr.msra.gmra.mxu2 %v91_v16  ;;  %167 = vmatmul.f32.vlgmr.msra.gmra.mxu3 %v95_v17 }
  0x2d   :  { %130 = vmatpush.msra.mxu0 %v99_v15  ;;  %332 = vmatpush.msra.mxu1 %v99_v15 }
  0x2e   :  { %131 = vmatmul.f32.vlgmr.msra.gmra.mxu0 %v83_v18  ;;  %143 = vmatmul.f32.vlgmr.msra.gmra.mxu1 %v87_v19 }
  0x34   :  { %158 = vmatmul.f32.gmra.mxu2 %v92_v20  ;;  %170 = vmatmul.f32.gmra.mxu3 %v96_v21 }
  0x36   :  { %134 = vmatmul.f32.gmra.mxu0 %v84_v22  ;;  %146 = vmatmul.f32.gmra.mxu1 %v88_v23 }
  0x3c   :  { %161 = vmatmul.f32.gmra.mxu2 %v93_v24  ;;  %173 = vmatmul.f32.gmra.mxu3 %v97_v25 }
  0x3e   :  { %137 = vmatmul.f32.gmra.mxu0 %v85_v26  ;;  %149 = vmatmul.f32.gmra.mxu1 %v89_v27 }
  0x44   :  { %164 = vmatmul.f32.gmra.mxu2 %v94_v28  ;;  %176 = vmatmul.f32.gmra.mxu3 %v98_v29 }
  0x46   :  { %140 = vmatmul.f32.gmra.mxu0 %v86_v30  ;;  %152 = vmatmul.f32.gmra.mxu1 %v90_v31 }
  0xab   :  { %v132_v33 = vpop.f32.mrf.mxu0  ;;  %v144_v34 = vpop.f32.mrf.mxu1 }
  0xac   :  { %v235_v35 = vadd.f32 %v340_v32, %v132_v33  ;;  %v239_v36 = vadd.f32 %v340_v32, %v144_v34 }
  0xae   :  { %251 = vst [vmem:[#allocation8] sm:$0xff] %v235_v35 }
  0xaf   :  { %255 = vst [vmem:[#allocation8 + $0x20] sm:$0xff] %v239_v36  ;;  %v156_v37 = vpop.f32.mrf.mxu2  ;;  %v168_v38 = vpop.f32.mrf.mxu3 }
  0xb0   :  { %v243_v39 = vadd.f32 %v340_v32, %v156_v37  ;;  %v247_v40 = vadd.f32 %v340_v32, %v168_v38 }
  0xb2   :  { %259 = vst [vmem:[#allocation8 + $0x40] sm:$0xff] %v243_v39 }
  0xb3   :  { %263 = vst [vmem:[#allocation8 + $0x60] sm:$0xff] %v247_v40  ;;  %v135_v41 = vpop.f32.mrf.mxu0  ;;  %v147_v42 = vpop.f32.mrf.mxu1 }
  0xb4   :  { %v236_v43 = vadd.f32 %v340_v32, %v135_v41  ;;  %v240_v44 = vadd.f32 %v340_v32, %v147_v42 }
  0xb6   :  { %252 = vst [vmem:[#allocation8 + $0x8] sm:$0xff] %v236_v43 }
  0xb7   :  { %256 = vst [vmem:[#allocation8 + $0x28] sm:$0xff] %v240_v44  ;;  %v159_v45 = vpop.f32.mrf.mxu2  ;;  %v171_v46 = vpop.f32.mrf.mxu3 }
  0xb8   :  { %v244_v47 = vadd.f32 %v340_v32, %v159_v45  ;;  %v248_v48 = vadd.f32 %v340_v32, %v171_v46 }
  0xba   :  { %260 = vst [vmem:[#allocation8 + $0x48] sm:$0xff] %v244_v47 }
  0xbb   :  { %264 = vst [vmem:[#allocation8 + $0x68] sm:$0xff] %v248_v48  ;;  %v138_v49 = vpop.f32.mrf.mxu0  ;;  %v150_v50 = vpop.f32.mrf.mxu1 }
  0xbc   :  { %v237_v51 = vadd.f32 %v340_v32, %v138_v49  ;;  %v241_v52 = vadd.f32 %v340_v32, %v150_v50 }
  0xbe   :  { %253 = vst [vmem:[#allocation8 + $0x10] sm:$0xff] %v237_v51 }
  0xbf   :  { %257 = vst [vmem:[#allocation8 + $0x30] sm:$0xff] %v241_v52  ;;  %v162_v53 = vpop.f32.mrf.mxu2  ;;  %v174_v54 = vpop.f32.mrf.mxu3 }
  0xc0   :  { %v245_v55 = vadd.f32 %v340_v32, %v162_v53  ;;  %v249_v56 = vadd.f32 %v340_v32, %v174_v54 }
  0xc2   :  { %261 = vst [vmem:[#allocation8 + $0x50] sm:$0xff] %v245_v55 }
  0xc3   :  { %265 = vst [vmem:[#allocation8 + $0x70] sm:$0xff] %v249_v56  ;;  %v141_v57 = vpop.f32.mrf.mxu0  ;;  %v153_v58 = vpop.f32.mrf.mxu1 }
  0xc4   :  { %v238_v59 = vadd.f32 %v340_v32, %v141_v57  ;;  %v242_v60 = vadd.f32 %v340_v32, %v153_v58 }
  0xc6   :  { %254 = vst [vmem:[#allocation8 + $0x18] sm:$0xff] %v238_v59 }
  0xc7   :  { %258 = vst [vmem:[#allocation8 + $0x38] sm:$0xff] %v242_v60  ;;  %v165_v61 = vpop.f32.mrf.mxu2  ;;  %v177_v62 = vpop.f32.mrf.mxu3 }
  0xc8   :  { %v246_v63 = vadd.f32 %v340_v32, %v165_v61  ;;  %v250_v0 = vadd.f32 %v340_v32, %v177_v62 }
  0xca   :  { %262 = vst [vmem:[#allocation8 + $0x58] sm:$0xff] %v246_v63 }
  0xcb   :  { %266 = vst [vmem:[#allocation8 + $0x78] sm:$0xff] %v250_v0 }
  0xcc   :  { %279 = dma.vmem_to_hbm [thread:$0]  %s272_s24, 2048, %s274_s27, [#allocation5], %s420_s20, %s420_s20, %s421_s21  }
  0xcd   :  { %417 = dma.done.wait [#allocation5], 2048  }
  0xce   :  { %418 = vsyncadd [#allocation5], 4294965248 }
  0xcf   :  { %284 = vsyncpa [#allocation4], 1 }
  0xd0   :  { %285 = vsyncpa [#allocation7], 1 }
  0xd1   :  { %286 = vsyncpa [#allocation5], 1 }

</bundles_post_ra>
